<compile_context>
chip_gen: v5e
topology: v5e:2x2
jax: 0.10.0
libtpu: 0.0.40
codegen_flags: <defaults>
</compile_context>

<pallas_src>
import jax
import jax.numpy as jnp
from jax.experimental import pallas as pl
from jax.experimental.pallas import tpu as pltpu


def _vmem_capacity_bytes():
    try:
        return int(pltpu.get_tpu_info().vmem_capacity_bytes)
    except Exception:
        return 64 * 1024 * 1024  # conservative (v7x-sized) fallback


def _make_kernel(TS, S, ragged_s, use_highest_precision):
    precision = jax.lax.Precision.HIGHEST if use_highest_precision else None

    def kernel(h_ref, m_ref, inv_ref, o_ref):
        # h_ref:   (TB, TS, TH)  native dtype
        # m_ref:   (TB, 1, TS)   native dtype (0/1)
        # inv_ref: (TB, 1, 1)    float32 (1 / clamp(mask count, 1e-9))
        # o_ref:   (TB, 1, TH)   float32  -- doubles as the accumulator
        k = pl.program_id(2)

        @pl.when(k == 0)
        def _init():
            o_ref[...] = jnp.zeros_like(o_ref)

        h = h_ref[...]
        m = m_ref[...]

        if ragged_s:
            # Last S-tile hangs over the end of the array: the un-copied region
            # of the VMEM buffer holds stale data (possibly NaN).  Zero both h
            # and the mask beyond S so the MXU sum stays exact.
            s0 = k * TS
            h_idx = s0 + jax.lax.broadcasted_iota(jnp.int32, h.shape, 1)
            h = jnp.where(h_idx < S, h, jnp.zeros_like(h))
            m_idx = s0 + jax.lax.broadcasted_iota(jnp.int32, m.shape, 2)
            m = jnp.where(m_idx < S, m, jnp.zeros_like(m))

        # Masked sum over the sequence tile as a batched (1,TS)x(TS,TH) MXU
        # matmul, accumulated in f32 directly in the (resident) output block.
        o_ref[...] += jnp.einsum(
            "bks,bsh->bkh",
            m,
            h,
            preferred_element_type=jnp.float32,
            precision=precision,
        )

        @pl.when(k == pl.num_programs(2) - 1)
        def _finalize():
            o_ref[...] = o_ref[...] * inv_ref[...]

    return kernel


def _choose_tiles(B, S, H, itemsize, budget_bytes):
    """Pick (TB, TS, TH).

    TB divides B exactly (<= 8); TH divides H exactly (multiple of 128, or H
    itself when H is not 128-aligned); TS is S (full) or a multiple of 128
    (the ragged tail is handled in-kernel).  Only the S axis may be ragged, so
    the wrapper never has to pad (or copy) the hidden state.
    """
    # Batch tile: exact divisor of B, at most 8 rows per block.
    if B <= 8:
        TB = B
    else:
        TB = next(d for d in (8, 7, 6, 5, 4, 3, 2, 1) if B % d == 0)

    # Hidden tile candidates (largest first): H itself, or 128-aligned divisors.
    if H % 128 != 0:
        th_options = [H]
    else:
        q = H // 128
        th_options = [128 * d for d in range(q, 0, -1) if q % d == 0]
        # When the batch axis gives no parallelism (B <= 8 -> one batch tile),
        # prefer >= 2 hidden tiles so v7x megacore has a parallel axis to split.
        if B <= 8 and H >= 256:
            capped = [t for t in th_options if t <= H // 2]
            if capped:
                th_options = capped

    def fits(ts, th):
        return TB * ts * th * itemsize <= budget_bytes

    for th in th_options:
        if fits(S, th):
            return TB, S, th                       # whole sequence in one tile
        ts = (budget_bytes // (TB * th * itemsize)) // 128 * 128
        if ts >= 128:
            return TB, ts, th                      # 128-aligned sequence tile

    # Fallback: smallest legal tiles (budget is a soft target; vmem_limit_bytes
    # below is derived from the real footprint anyway).
    return TB, (S if S < 128 else 128), th_options[-1]


def mean_pooling(last_hidden_state, attention_mask, *, vmem_budget_bytes=None):
    """last_hidden_state: (B, S, H) float dtype; attention_mask: (B, S) 0/1.

    Returns (B, H) float32 masked mean over the sequence axis.
    """
    B, S, H = last_hidden_state.shape
    h = last_hidden_state                                   # native dtype stream
    itemsize = jnp.dtype(h.dtype).itemsize

    # Tiny side inputs: lane-dense mask (B,1,S) in h's dtype (0/1 exact), and the
    # per-row reciprocal denominator (B,1,1) f32 (hoisted out of the hot loop).
    m = attention_mask.astype(h.dtype)[:, None, :]          # (B, 1, S)
    denom = jnp.clip(jnp.sum(attention_mask.astype(jnp.float32), axis=1), 1e-9, None)
    inv = (1.0 / denom).reshape(B, 1, 1).astype(jnp.float32)  # (B, 1, 1)

    vmem_cap = _vmem_capacity_bytes()
    if vmem_budget_bytes is None:
        # ~16 MiB / buffer on v5e/v6e (128 MiB VMEM), ~8 MiB on v7x (64 MiB).
        vmem_budget_bytes = max(2 << 20, vmem_cap // 8)

    TB, TS, TH = _choose_tiles(B, S, H, itemsize, vmem_budget_bytes)
    nb = B // TB
    nh = pl.cdiv(H, TH)
    nk = pl.cdiv(S, TS)
    ragged_s = (S % TS) != 0

    kernel = _make_kernel(TS, S, ragged_s, jnp.dtype(h.dtype) == jnp.float32)

    # Real VMEM footprint (double-buffered blocks) + slack -> vmem_limit_bytes.
    footprint = (
        2 * TB * TS * TH * itemsize       # hidden block
        + 2 * TB * 1 * TS * itemsize      # mask block
        + 2 * TB * 1 * TH * 4             # output/accumulator block
        + 2 * TB * 1 * 1 * 4              # reciprocal block
    )
    vmem_limit = int(min(vmem_cap - (2 << 20), max(2 * footprint + (1 << 20), 8 << 20)))

    cost = pl.CostEstimate(
        flops=2 * B * S * H,
        transcendentals=0,
        bytes_accessed=B * S * H * itemsize + B * S * itemsize + B * H * 4 + B * 4,
    )

    out = pl.pallas_call(
        kernel,
        out_shape=jax.ShapeDtypeStruct((B, 1, H), jnp.float32),
        grid_spec=pltpu.PrefetchScalarGridSpec(
            num_scalar_prefetch=0,
            grid=(nb, nh, nk),
            in_specs=[
                pl.BlockSpec((TB, TS, TH), lambda b, hi, k: (b, k, hi)),
                pl.BlockSpec((TB, 1, TS), lambda b, hi, k: (b, 0, k)),
                pl.BlockSpec((TB, 1, 1), lambda b, hi, k: (b, 0, 0)),
            ],
            out_specs=pl.BlockSpec((TB, 1, TH), lambda b, hi, k: (b, 0, hi)),
        ),
        compiler_params=pltpu.CompilerParams(
            dimension_semantics=("parallel", "parallel", "arbitrary"),
            vmem_limit_bytes=vmem_limit,
        ),
        cost_estimate=cost,
    )(h, m, inv)
    return out[:, 0, :]


def mean_pooling_ref(last_hidden_state, attention_mask):
    m = attention_mask.astype(jnp.float32)[..., None]
    sum_emb = jnp.sum(last_hidden_state.astype(jnp.float32) * m, axis=1)
    sum_mask = jnp.clip(jnp.sum(m, axis=1), 1e-9, None)
    return sum_emb / sum_mask


if __name__ == "__main__":
    key = jax.random.PRNGKey(0)
    k1, k2, k3, k4, k5, k6 = jax.random.split(key, 6)

    # Shapes implied by the module: batch=2, seq=8, hidden=32.
    B, S, H = 2, 8, 32
    last_hidden_state = jax.random.normal(k1, (B, S, H), dtype=jnp.float32)
    attention_mask = (jax.random.uniform(k2, (B, S)) > 0.3).astype(jnp.int32)

    out = jax.block_until_ready(mean_pooling(last_hidden_state, attention_mask))
    ref = mean_pooling_ref(last_hidden_state, attention_mask)
    assert out.shape == (B, H)
    assert bool(jnp.allclose(out, ref, atol=1e-5, rtol=1e-5)), "f32 mismatch vs reference"

    # bf16 streaming path: native-dtype HBM reads, f32 accumulation in-kernel.
    h_bf16 = last_hidden_state.astype(jnp.bfloat16)
    out_bf16 = jax.block_until_ready(mean_pooling(h_bf16, attention_mask))
    ref_bf16 = mean_pooling_ref(h_bf16, attention_mask)
    assert bool(jnp.allclose(out_bf16, ref_bf16, atol=2e-2, rtol=2e-2)), "bf16 mismatch"

    # S-tiled accumulator path (tiny budget forces TS=128, two reduction steps).
    B2, S2, H2 = 2, 256, 128
    h2 = jax.random.normal(k3, (B2, S2, H2), dtype=jnp.float32)
    m2 = (jax.random.uniform(k4, (B2, S2)) > 0.5).astype(jnp.int32)
    out2 = jax.block_until_ready(mean_pooling(h2, m2, vmem_budget_bytes=64 * 1024))
    ref2 = mean_pooling_ref(h2, m2)
    assert bool(jnp.allclose(out2, ref2, atol=1e-4, rtol=1e-4)), "tiled mismatch"

    # Ragged sequence + H-tiled parallel axis, no wrapper padding of h:
    # S=300 with TS=128 -> 3 reduction steps, last one masked in-kernel;
    # H=256 with TH=128 -> 2 "parallel" hidden tiles; TB=3.
    B3, S3, H3 = 3, 300, 256
    h3 = jax.random.normal(k5, (B3, S3, H3), dtype=jnp.float32)
    m3 = (jax.random.uniform(k6, (B3, S3)) > 0.5).astype(jnp.int32)
    out3 = jax.block_until_ready(mean_pooling(h3, m3, vmem_budget_bytes=256 * 1024))
    ref3 = mean_pooling_ref(h3, m3)
    assert bool(jnp.allclose(out3, ref3, atol=1e-4, rtol=1e-4)), "ragged-S mismatch"

    print("KERNEL_OK")
</pallas_src>

<mosaic_0001>
module attributes {stable_mosaic.version = 11 : i64} {
  func.func @kernel(%arg0: i32, %arg1: i32, %arg2: i32, %arg3: memref<2x8x32xf32, #tpu.memory_space<vmem>>, %arg4: memref<2x1x8xf32, #tpu.memory_space<vmem>>, %arg5: memref<2x1x1xf32, #tpu.memory_space<vmem>>, %arg6: memref<2x1x32xf32, #tpu.memory_space<vmem>>) attributes {dimension_semantics = [#tpu.dimension_semantics<parallel>, #tpu.dimension_semantics<parallel>, #tpu.dimension_semantics<arbitrary>], iteration_bounds = array<i64: 1, 1, 1>, scalar_prefetch = 0 : i64, scratch_operands = 0 : i64, tpu.core_type = #tpu.core_type<tc>, window_params = [{transform_indices = @transform_0, window_bounds = array<i64: 2, 8, 32>}, {transform_indices = @transform_1, window_bounds = array<i64: 2, 1, 8>}, {transform_indices = @transform_2, window_bounds = array<i64: 2, 1, 1>}, {transform_indices = @transform_3, window_bounds = array<i64: 2, 1, 32>}]} {
    %c0_i32 = arith.constant 0 : i32
    %0 = arith.cmpi eq, %arg2, %c0_i32 : i32
    %1 = arith.extui %0 : i1 to i32
    %c0_i32_0 = arith.constant 0 : i32
    %2 = arith.cmpi ne, %1, %c0_i32_0 : i32
    scf.if %2 {
      %cst_14 = arith.constant 0.000000e+00 : f32
      %12 = vector.broadcast %cst_14 : f32 to vector<2x1x32xf32>
      %c0_15 = arith.constant 0 : index
      %c0_16 = arith.constant 0 : index
      %c0_17 = arith.constant 0 : index
      %13 = vector.load %arg6[%c0_15, %c0_16, %c0_17] : memref<2x1x32xf32, #tpu.memory_space<vmem>>, vector<2x1x32xf32>
      tpu.vector_store %arg6[%c0_15, %c0_16, %c0_17], %12 {strides = array<i32>} : memref<2x1x32xf32, #tpu.memory_space<vmem>>, vector<2x1x32xf32>,
    } else {
    }
    %c0 = arith.constant 0 : index
    %c0_1 = arith.constant 0 : index
    %c0_2 = arith.constant 0 : index
    %3 = vector.load %arg3[%c0, %c0_1, %c0_2] : memref<2x8x32xf32, #tpu.memory_space<vmem>>, vector<2x8x32xf32>
    %c0_3 = arith.constant 0 : index
    %c0_4 = arith.constant 0 : index
    %c0_5 = arith.constant 0 : index
    %4 = vector.load %arg4[%c0_3, %c0_4, %c0_5] : memref<2x1x8xf32, #tpu.memory_space<vmem>>, vector<2x1x8xf32>
    %c0_6 = arith.constant 0 : index
    %c0_7 = arith.constant 0 : index
    %c0_8 = arith.constant 0 : index
    %5 = vector.load %arg6[%c0_6, %c0_7, %c0_8] : memref<2x1x32xf32, #tpu.memory_space<vmem>>, vector<2x1x32xf32>
    "tpu.trace_start"() <{level = 10 : i32, message = "bks,bsh->bkh"}> : () -> ()
    %cst = arith.constant dense<0.000000e+00> : vector<2x1x32xf32>
    %6 = tpu.matmul %4, %3, %cst {dimension_numbers = #tpu.dot_dimension_numbers<[2], [1], [1], [2], [0, 0, 0, 1, 1, 2], [0], [0]>, precision = #tpu.contract_precision<fp32>} : vector<2x1x8xf32>, vector<2x8x32xf32>, vector<2x1x32xf32> -> vector<2x1x32xf32>
    "tpu.trace_stop"() : () -> ()
    %7 = arith.addf %5, %6 : vector<2x1x32xf32>
    %c0_9 = arith.constant 0 : index
    %c0_10 = arith.constant 0 : index
    %c0_11 = arith.constant 0 : index
    %8 = vector.load %arg6[%c0_9, %c0_10, %c0_11] : memref<2x1x32xf32, #tpu.memory_space<vmem>>, vector<2x1x32xf32>
    tpu.vector_store %arg6[%c0_9, %c0_10, %c0_11], %7 {strides = array<i32>} : memref<2x1x32xf32, #tpu.memory_space<vmem>>, vector<2x1x32xf32>,
    %c0_i32_12 = arith.constant 0 : i32
    %9 = arith.cmpi eq, %arg2, %c0_i32_12 : i32
    %10 = arith.extui %9 : i1 to i32
    %c0_i32_13 = arith.constant 0 : i32
    %11 = arith.cmpi ne, %10, %c0_i32_13 : i32
    scf.if %11 {
      %c0_14 = arith.constant 0 : index
      %c0_15 = arith.constant 0 : index
      %c0_16 = arith.constant 0 : index
      %12 = vector.load %arg6[%c0_14, %c0_15, %c0_16] : memref<2x1x32xf32, #tpu.memory_space<vmem>>, vector<2x1x32xf32>
      %c0_17 = arith.constant 0 : index
      %c0_18 = arith.constant 0 : index
      %c0_19 = arith.constant 0 : index
      %13 = vector.load %arg5[%c0_17, %c0_18, %c0_19] : memref<2x1x1xf32, #tpu.memory_space<vmem>>, vector<2x1x1xf32>
      %14 = vector.broadcast %13 : vector<2x1x1xf32> to vector<2x1x32xf32>
      %15 = arith.mulf %12, %14 : vector<2x1x32xf32>
      %c0_20 = arith.constant 0 : index
      %c0_21 = arith.constant 0 : index
      %c0_22 = arith.constant 0 : index
      %16 = vector.load %arg6[%c0_20, %c0_21, %c0_22] : memref<2x1x32xf32, #tpu.memory_space<vmem>>, vector<2x1x32xf32>
      tpu.vector_store %arg6[%c0_20, %c0_21, %c0_22], %15 {strides = array<i32>} : memref<2x1x32xf32, #tpu.memory_space<vmem>>, vector<2x1x32xf32>,
    } else {
    }
    return
  }
  func.func @transform_0(%arg0: i32, %arg1: i32, %arg2: i32) -> (i32, i32, i32) {
    %c0_i32 = arith.constant 0 : i32
    return %arg0, %arg2, %arg1 : i32, i32, i32
  }
  func.func @transform_1(%arg0: i32, %arg1: i32, %arg2: i32) -> (i32, i32, i32) {
    %c0_i32 = arith.constant 0 : i32
    %c0_i32_0 = arith.constant 0 : i32
    return %arg0, %c0_i32, %arg2 : i32, i32, i32
  }
  func.func @transform_2(%arg0: i32, %arg1: i32, %arg2: i32) -> (i32, i32, i32) {
    %c0_i32 = arith.constant 0 : i32
    %c0_i32_0 = arith.constant 0 : i32
    %c0_i32_1 = arith.constant 0 : i32
    return %arg0, %c0_i32, %c0_i32_0 : i32, i32, i32
  }
  func.func @transform_3(%arg0: i32, %arg1: i32, %arg2: i32) -> (i32, i32, i32) {
    %c0_i32 = arith.constant 0 : i32
    %c0_i32_0 = arith.constant 0 : i32
    return %arg0, %c0_i32, %arg1 : i32, i32, i32
  }
}

</mosaic_0001>

<bundles_post_ra>
// kernel: tpu_custom_call.1
= control target key start
LH: loop header
LB: loop body
LE: loop exit
PB: predicated region body
PF: predicated region fallthrough
CT: control target
= control target key end

     0   :  { %8 = vsyncpa [#allocation3], 0  ;;  %s503_s0 = inlined_call_operand.hbm [shape: f32[2,8,32], index: 0, kind: input, shape index: {}]   ;;  %s504_s1 = inlined_call_operand.vmem [shape: f32[2,1,8], index: 1, kind: input, shape index: {}]   ;;  %s505_s2 = inlined_call_operand.vmem [shape: f32[2,1,1], index: 2, kind: input, shape index: {}]   ;;  %s506_s3 = inlined_call_operand.hbm [shape: f32[2,1,32], index: 3, kind: output, shape index: {}]  }
   0x1   :  { %9 = vsyncpa [#allocation4], 0  ;;  %s14_s14 = sshll.u32 %s503_s0, 4  ;;  %s451_s15 = smov [#allocation2]   ;;  %s15_s14 = int_to_ptr.hbm [resolvable:$true] %s14_s14 }
   0x2   :  { %s16_s16 = sshll.u32 %s451_s15, 4  ;;  %s452_s17 = smov 128   ;;  %s17_s16 = int_to_ptr.vmem [resolvable:$true] %s16_s16 }
   0x3   :  { %s453_s18 = smov 8  }
   0x4   :  { %22 = dma.hbm_to_vmem [thread:$0]  %s15_s14, 256, %s17_s16, [#allocation3], %s452_s17, %s452_s17, %s453_s18  }
   0x5   :  { %447 = dma.done.wait [#allocation3], 256  }
   0x6   :  { %448 = vsyncadd [#allocation3], 4294967040  ;;  %v454_v0 = vmov 0   ;;  %vm44_vm0 = vcmask 64512   ;;  %v38_v1 = vld [vmem:[#allocation2] sm:$0xff]  ;;  %v39_v7 = vld [vmem:[#allocation2 + $0x8] sm:$0xff] }
   0x7   :  { %398 = vset.pattern.permute.xlu0 %v454_v0  ;;  %v40_v2 = vld [vmem:[%s504_s1] sm:$0x1]  ;;  %v41_v3 = vld [vmem:[%s504_s1 + $0x1] sm:$0x1]  ;;  %v63_v4 = vand.u32 4294901760, %v38_v1  ;;  %v212_v11 = vand.u32 4294901760, %v39_v7 }
   0x8   :  { %v46_v5 = vsel %vm44_vm0, %v40_v2, 0  ;;  %v195_v6 = vsel %vm44_vm0, %v41_v3, 0  ;;  %v353_v8 = vld [vmem:[%s505_s2] sm:$0x1]  ;;  %v354_v21 = vld [vmem:[%s505_s2 + $0x1] sm:$0x1] }
   0x9   :  { %v65_v9 = vand.u32 4294901760, %v46_v5  ;;  %v214_v10 = vand.u32 4294901760, %v195_v6  ;;  %357 = vperm.xlu0 %398, %v353_v8   ;;  %v90_v12 = vsub.f32 %v38_v1, %v63_v4  ;;  %140 = vmatpush.msra.mxu3 %v63_v4  ;;  %v239_v15 = vsub.f32 %v39_v7, %v212_v11  ;;  %s456_s2 = smov [#allocation5]   ;;  %s377_s28 = sshll.u32 %s506_s3, 4  ;;  %s378_s28 = int_to_ptr.hbm [resolvable:$true] %s377_s28 }
   0xa   :  { %64 = vmatpush.msra.mxu0 %v63_v4  ;;  %vm35_vm1 = vcmask 253952   ;;  %v455_v29 = vmov 0.0   ;;  %s375_s25 = sshll.u32 %s456_s2, 4  ;;  %s457_s29 = smov 16   ;;  %s376_s25 = int_to_ptr.vmem [resolvable:$true] %s375_s25 }
   0xb   :  { %v66_v13 = vsub.f32 %v46_v5, %v65_v9  ;;  %v215_v14 = vsub.f32 %v195_v6, %v214_v10  ;;  %117 = vmatpush.msra.mxu2 %v90_v12  ;;  %v91_v16 = vand.u32 4294901760, %v90_v12  ;;  %v240_v18 = vand.u32 4294901760, %v239_v15  ;;  %36 = vst.msk [vmem:[#allocation5] sm:$0x1] %vm35_vm1, %v455_v29  ;;  %s458_s30 = smov 1  }
   0xc   :  { %37 = vst.msk [vmem:[#allocation5 + $0x1] sm:$0x1] %vm35_vm1, %v455_v29 }
   0xd   :  { %120 = vmatmul.f32.vlgmr.msra.gmra.mxu2 %v66_v13  ;;  %v67_v17 = vand.u32 4294901760, %v66_v13  ;;  %v216_v19 = vand.u32 4294901760, %v215_v14  ;;  %v92_v20 = vsub.f32 %v90_v12, %v91_v16  ;;  %166 = vmatpush.msrb.mxu0 %v91_v16  ;;  %v241_v23 = vsub.f32 %v239_v15, %v240_v18 }
   0xe   :  { %213 = vmatpush.msrb.mxu2 %v212_v11 }
   0xf   :  { %144 = vmatmul.f32.vlgmr.msra.gmra.mxu3 %v67_v17  ;;  %v68_v22 = vsub.f32 %v66_v13, %v67_v17  ;;  %v217_v24 = vsub.f32 %v215_v14, %v216_v19  ;;  %v93_v25 = vand.u32 4294901760, %v92_v20  ;;  %v242_v27 = vand.u32 4294901760, %v241_v23 }
  0x10   :  { %315 = vmatpush.msra.mxu2 %v240_v18 }
  0x11   :  { %v69_v26 = vand.u32 4294901760, %v68_v22  ;;  %v218_v28 = vand.u32 4294901760, %v217_v24  ;;  %363 = vperm.xlu0 %398, %v354_v21   ;;  %94 = vmatpush.msra.mxu1 %v93_v25 }
  0x12   :  { %96 = vmatmul.f32.vlgmr.msra.gmra.mxu1 %v65_v9  ;;  %243 = vmatpush.msrb.mxu3 %v242_v27  ;;  %v42_v41 = vld [vmem:[#allocation5] sm:$0x1] }
  0x13   :  { %70 = vmatmul.f32.vlgmr.msra.gmra.mxu0 %v69_v26  ;;  %188 = vmatpush.msrb.mxu1 %v63_v4  ;;  %v43_v56 = vld [vmem:[#allocation5 + $0x1] sm:$0x1] }
  0x14   :  { %266 = vmatpush.msra.mxu0 %v239_v15  ;;  %337 = vmatpush.msra.mxu3 %v212_v11 }
  0x15   :  { %219 = vmatmul.f32.vlgmr.msrb.gmra.mxu2 %v218_v28  ;;  %289 = vmatpush.msra.mxu1 %v212_v11 }
  0x17   :  { %245 = vmatmul.f32.vlgmr.msrb.gmra.mxu3 %v214_v10 }
  0x1a   :  { %190 = vmatmul.f32.vlgmr.msrb.gmra.mxu1 %v65_v9 }
  0x1b   :  { %168 = vmatmul.f32.vlgmr.msrb.gmra.mxu0 %v65_v9 }
  0x1d   :  { %317 = vmatmul.f32.vlgmr.msra.gmra.mxu2 %v214_v10 }
  0x1f   :  { %339 = vmatmul.f32.vlgmr.msra.gmra.mxu3 %v214_v10 }
  0x22   :  { %293 = vmatmul.f32.vlgmr.msra.gmra.mxu1 %v216_v19 }
  0x23   :  { %269 = vmatmul.f32.vlgmr.msra.gmra.mxu0 %v215_v14 }
  0x7b   :  { %v358_v49 = vpop.permute.xlu0 %357 }
  0x7c   :  { %v360_v51 = vperm.slane %v358_v49, 0 }
  0x83   :  { %v364_v60 = vpop.permute.xlu0 %363 }
  0x84   :  { %v366_v61 = vperm.slane %v364_v60, 0 }
  0x8f   :  { %v97_v31 = vpop.f32.mrf.mxu1 }
  0x90   :  { %v71_v30 = vpop.f32.mrf.mxu0  ;;  %v121_v33 = vpop.f32.mrf.mxu2 }
  0x91   :  { %v98_v32 = vadd.f32 %v97_v31, %v71_v30 }
  0x92   :  { %v145_v34 = vpop.f32.mrf.mxu3 }
  0x93   :  { %v122_v35 = vadd.f32 %v121_v33, %v98_v32 }
  0x95   :  { %v146_v36 = vadd.f32 %v145_v34, %v122_v35 }
  0x97   :  { %v191_v38 = vpop.f32.mrf.mxu1 }
  0x98   :  { %v169_v37 = vpop.f32.mrf.mxu0  ;;  %v220_v40 = vpop.f32.mrf.mxu2 }
  0x99   :  { %v170_v39 = vadd.f32 %v169_v37, %v146_v36 }
  0x9a   :  { %v246_v43 = vpop.f32.mrf.mxu3 }
  0x9b   :  { %v192_v42 = vadd.f32 %v191_v38, %v170_v39  ;;  %v247_v45 = vadd.f32 %v246_v43, %v220_v40 }
  0x9d   :  { %v343_v44 = vadd.f32 %v192_v42, %v42_v41 }
  0x9f   :  { %346 = vst.msk [vmem:[#allocation5] sm:$0x1] %vm35_vm1, %v343_v44  ;;  %v294_v47 = vpop.f32.mrf.mxu1 }
  0xa0   :  { %v270_v46 = vpop.f32.mrf.mxu0  ;;  %v318_v50 = vpop.f32.mrf.mxu2 }
  0xa1   :  { %v271_v48 = vadd.f32 %v270_v46, %v247_v45 }
  0xa2   :  { %v340_v53 = vpop.f32.mrf.mxu3 }
  0xa3   :  { %v295_v52 = vadd.f32 %v294_v47, %v271_v48 }
  0xa5   :  { %v319_v54 = vadd.f32 %v318_v50, %v295_v52 }
  0xa6   :  { %v351_v55 = vld [vmem:[#allocation5] sm:$0x1] }
  0xa7   :  { %v367_v57 = vmul.f32 %v360_v51, %v351_v55  ;;  %v341_v58 = vadd.f32 %v340_v53, %v319_v54 }
  0xa9   :  { %369 = vst.msk [vmem:[#allocation5] sm:$0x1] %vm35_vm1, %v367_v57  ;;  %v344_v59 = vadd.f32 %v341_v58, %v43_v56 }
  0xab   :  { %347 = vst.msk [vmem:[#allocation5 + $0x1] sm:$0x1] %vm35_vm1, %v344_v59 }
  0xb2   :  { %v352_v62 = vld [vmem:[#allocation5 + $0x1] sm:$0x1] }
  0xb3   :  { %v368_v63 = vmul.f32 %v366_v61, %v352_v62 }
  0xb5   :  { %370 = vst.msk [vmem:[#allocation5 + $0x1] sm:$0x1] %vm35_vm1, %v368_v63 }
  0xb6   :  { %383 = dma.vmem_to_hbm [thread:$0]  %s376_s25, 32, %s378_s28, [#allocation4], %s457_s29, %s457_s29, %s458_s30  }
  0xb7   :  { %449 = dma.done.wait [#allocation4], 32  }
  0xb8   :  { %450 = vsyncadd [#allocation4], 4294967264 }
  0xb9   :  { %388 = vsyncpa [#allocation3], 1 }
  0xba   :  { %389 = vsyncpa [#allocation4], 1 }

</bundles_post_ra>
